<compile_context>
chip_gen: v5e
topology: v5e:2x2
jax: 0.10.0
libtpu: 0.0.40
codegen_flags: <defaults>
</compile_context>

<pallas_src>
import jax
import jax.numpy as jnp
import numpy as np
from jax.experimental import pallas as pl
from jax.experimental.pallas import tpu as pltpu


_TILE_BUDGET_BYTES = 4 * 1024 * 1024     # per (C, THW) tile
_VMEM_LIMIT_BYTES = 40 * 1024 * 1024     # 2x(in+out) tiles + headroom, < v7x 64 MiB


def _choose_spatial_tile(hw, c, itemsize, budget_bytes=_TILE_BUDGET_BYTES):
    """Largest multiple of 128 dividing HW with a (C, THW) tile within budget.
    Falls back to the full extent (always a legal block) if HW is not 128-aligned."""
    if hw % 128 != 0:
        return hw
    max_t = max(128, (budget_bytes // (c * itemsize)) // 128 * 128)
    best = 128
    t = 128
    while t <= hw:
        if hw % t == 0 and t <= max_t:
            best = t
        t += 128
    return best


def _pool_sum_kernel(x_ref, sum_ref):
    # x_ref block: (1, C, THW); sum_ref block: (1, C, 1) f32 accumulator that
    # stays resident across the last ("arbitrary") spatial-tile grid axis.
    @pl.when(pl.program_id(1) == 0)
    def _():
        sum_ref[...] = jnp.zeros_like(sum_ref)

    xb = x_ref[0].astype(jnp.float32)                     # (C, THW)
    sum_ref[0] += jnp.sum(xb, axis=1, keepdims=True)      # lane reduction -> (C, 1)


def _rescale_kernel(x_ref, s_ref, o_ref):
    # x_ref block: (1, C, THW); s_ref block: (1, C, 1) -> lane-broadcast multiply.
    x = x_ref[0].astype(jnp.float32)                      # (C, THW)
    o_ref[0] = (x * s_ref[0]).astype(o_ref.dtype)


@jax.jit
def cam_forward(x_nchw, w1, b1, w2, b2):
    """x_nchw: (B, C, H, W).  w1: (Cr, C), b1: (Cr,), w2: (C, Cr), b2: (C,)
    (PyTorch nn.Linear weight layout: (out_features, in_features))."""
    B, C, H, W = x_nchw.shape
    HW = H * W
    itemsize = jnp.dtype(x_nchw.dtype).itemsize

    x = x_nchw.reshape(B, C, HW)                          # free: no transpose
    thw = _choose_spatial_tile(HW, C, itemsize)
    n_t = HW // thw

    params_pool = pltpu.CompilerParams(
        dimension_semantics=("parallel", "arbitrary"),
        vmem_limit_bytes=_VMEM_LIMIT_BYTES)
    params_scale = pltpu.CompilerParams(
        dimension_semantics=("parallel", "parallel"),
        vmem_limit_bytes=_VMEM_LIMIT_BYTES)

    # Pass 1: spatially-tiled per-channel sums, accumulated in f32.
    sums = pl.pallas_call(
        _pool_sum_kernel,
        out_shape=jax.ShapeDtypeStruct((B, C, 1), jnp.float32),
        grid_spec=pltpu.PrefetchScalarGridSpec(
            num_scalar_prefetch=0,
            grid=(B, n_t),
            in_specs=[pl.BlockSpec((1, C, thw), lambda b, t: (b, 0, t))],
            out_specs=pl.BlockSpec((1, C, 1), lambda b, t: (b, 0, 0)),
        ),
        compiler_params=params_pool,
    )(x)

    # Tiny MLP (C -> C//r -> C) + Softsign, batched once across B in plain JAX.
    mean = sums[:, :, 0] / jnp.float32(HW)                               # (B, C)
    h = mean @ w1.astype(jnp.float32).T + b1.astype(jnp.float32)         # (B, Cr)
    h = h / (1.0 + jnp.abs(h))
    s = h @ w2.astype(jnp.float32).T + b2.astype(jnp.float32)            # (B, C)
    s = s / (1.0 + jnp.abs(s))
    scale = s[:, :, None]                                                # (B, C, 1)

    # Pass 2: lane-dense channel-wise rescale of x.
    out = pl.pallas_call(
        _rescale_kernel,
        out_shape=jax.ShapeDtypeStruct((B, C, HW), x_nchw.dtype),
        grid_spec=pltpu.PrefetchScalarGridSpec(
            num_scalar_prefetch=0,
            grid=(B, n_t),
            in_specs=[
                pl.BlockSpec((1, C, thw), lambda b, t: (b, 0, t)),
                pl.BlockSpec((1, C, 1), lambda b, t: (b, 0, 0)),
            ],
            out_specs=pl.BlockSpec((1, C, thw), lambda b, t: (b, 0, t)),
        ),
        compiler_params=params_scale,
    )(x, scale)

    return out.reshape(B, C, H, W)


def cam_reference(x_nchw, w1, b1, w2, b2):
    """Pure-JAX reference mirroring the PyTorch module exactly."""
    m = jnp.mean(x_nchw, axis=(2, 3))                     # (B, C)
    h = m @ w1.T + b1                                     # (B, Cr)
    h = h / (1.0 + jnp.abs(h))
    s = h @ w2.T + b2                                     # (B, C)
    s = s / (1.0 + jnp.abs(s))
    return x_nchw * s[:, :, None, None]


if __name__ == "__main__":
    B, C, H, W = 2, 4, 16, 16
    reduction_ratio = 2
    Cr = C // reduction_ratio

    key = jax.random.PRNGKey(0)
    kx, k1, k2, k3, k4 = jax.random.split(key, 5)

    x = jax.random.normal(kx, (B, C, H, W), dtype=jnp.float32)

    # Deterministic nn.Linear-style init (uniform(-1/sqrt(fan_in), 1/sqrt(fan_in)))
    bound1 = 1.0 / np.sqrt(C)
    w1 = jax.random.uniform(k1, (Cr, C), jnp.float32, -bound1, bound1)
    b1 = jax.random.uniform(k2, (Cr,), jnp.float32, -bound1, bound1)
    bound2 = 1.0 / np.sqrt(Cr)
    w2 = jax.random.uniform(k3, (C, Cr), jnp.float32, -bound2, bound2)
    b2 = jax.random.uniform(k4, (C,), jnp.float32, -bound2, bound2)

    out = cam_forward(x, w1, b1, w2, b2)
    out = jax.block_until_ready(out)

    ref = cam_reference(x, w1, b1, w2, b2)
    assert out.shape == (B, C, H, W)
    np.testing.assert_allclose(np.asarray(out), np.asarray(ref),
                               rtol=1e-5, atol=1e-5)
    print("KERNEL_OK")
</pallas_src>

<mosaic_0001>
module attributes {stable_mosaic.version = 11 : i64} {
  func.func @_pool_sum_kernel(%arg0: i32, %arg1: i32, %arg2: memref<1x4x256xf32, #tpu.memory_space<vmem>>, %arg3: memref<1x4x1xf32, #tpu.memory_space<vmem>>) attributes {dimension_semantics = [#tpu.dimension_semantics<parallel>, #tpu.dimension_semantics<arbitrary>], iteration_bounds = array<i64: 2, 1>, scalar_prefetch = 0 : i64, scratch_operands = 0 : i64, tpu.core_type = #tpu.core_type<tc>, window_params = [{transform_indices = @transform_0, window_bounds = array<i64: 1, 4, 256>}, {transform_indices = @transform_1, window_bounds = array<i64: 1, 4, 1>}]} {
    %c0_i32 = arith.constant 0 : i32
    %0 = arith.cmpi eq, %arg1, %c0_i32 : i32
    %1 = arith.extui %0 : i1 to i32
    %c0_i32_0 = arith.constant 0 : i32
    %2 = arith.cmpi ne, %1, %c0_i32_0 : i32
    scf.if %2 {
      %cst_9 = arith.constant 0.000000e+00 : f32
      %13 = vector.broadcast %cst_9 : f32 to vector<1x4x1xf32>
      %c0_10 = arith.constant 0 : index
      %c0_11 = arith.constant 0 : index
      %c0_12 = arith.constant 0 : index
      %14 = vector.load %arg3[%c0_10, %c0_11, %c0_12] : memref<1x4x1xf32, #tpu.memory_space<vmem>>, vector<1x4x1xf32>
      tpu.vector_store %arg3[%c0_10, %c0_11, %c0_12], %13 {strides = array<i32>} : memref<1x4x1xf32, #tpu.memory_space<vmem>>, vector<1x4x1xf32>,
    } else {
    }
    %c0 = arith.constant 0 : index
    %c0_1 = arith.constant 0 : index
    %c0_2 = arith.constant 0 : index
    %3 = vector.load %arg2[%c0, %c0_1, %c0_2] : memref<1x4x256xf32, #tpu.memory_space<vmem>>, vector<1x4x256xf32>
    %4 = vector.shape_cast %3 : vector<1x4x256xf32> to vector<4x256xf32>
    %c0_3 = arith.constant 0 : index
    %c0_4 = arith.constant 0 : index
    %c0_5 = arith.constant 0 : index
    %5 = vector.load %arg3[%c0_3, %c0_4, %c0_5] : memref<1x4x1xf32, #tpu.memory_space<vmem>>, vector<1x4x1xf32>
    %6 = vector.shape_cast %5 : vector<1x4x1xf32> to vector<4x1xf32>
    %cst = arith.constant dense<0.000000e+00> : vector<4xf32>
    %7 = vector.multi_reduction <add>, %4, %cst [1] : vector<4x256xf32> to vector<4xf32>
    %8 = vector.shape_cast %7 : vector<4xf32> to vector<4x1xf32>
    %9 = arith.addf %6, %8 : vector<4x1xf32>
    %c0_6 = arith.constant 0 : index
    %c0_7 = arith.constant 0 : index
    %c0_8 = arith.constant 0 : index
    %10 = vector.load %arg3[%c0_6, %c0_7, %c0_8] : memref<1x4x1xf32, #tpu.memory_space<vmem>>, vector<1x4x1xf32>
    %11 = vector.shape_cast %10 : vector<1x4x1xf32> to vector<4x1xf32>
    %12 = vector.shape_cast %9 : vector<4x1xf32> to vector<1x4x1xf32>
    tpu.vector_store %arg3[%c0_6, %c0_7, %c0_8], %12 {strides = array<i32>} : memref<1x4x1xf32, #tpu.memory_space<vmem>>, vector<1x4x1xf32>,
    return
  }
  func.func @transform_0(%arg0: i32, %arg1: i32) -> (i32, i32, i32) {
    %c0_i32 = arith.constant 0 : i32
    %c0_i32_0 = arith.constant 0 : i32
    return %arg0, %c0_i32, %arg1 : i32, i32, i32
  }
  func.func @transform_1(%arg0: i32, %arg1: i32) -> (i32, i32, i32) {
    %c0_i32 = arith.constant 0 : i32
    %c0_i32_0 = arith.constant 0 : i32
    %c0_i32_1 = arith.constant 0 : i32
    return %arg0, %c0_i32, %c0_i32_0 : i32, i32, i32
  }
}

module attributes {stable_mosaic.version = 11 : i64} {
  func.func @_rescale_kernel(%arg0: i32, %arg1: i32, %arg2: memref<1x4x256xf32, #tpu.memory_space<vmem>>, %arg3: memref<1x4x1xf32, #tpu.memory_space<vmem>>, %arg4: memref<1x4x256xf32, #tpu.memory_space<vmem>>) attributes {dimension_semantics = [#tpu.dimension_semantics<parallel>, #tpu.dimension_semantics<parallel>], iteration_bounds = array<i64: 2, 1>, scalar_prefetch = 0 : i64, scratch_operands = 0 : i64, tpu.core_type = #tpu.core_type<tc>, window_params = [{transform_indices = @transform_0, window_bounds = array<i64: 1, 4, 256>}, {transform_indices = @transform_1, window_bounds = array<i64: 1, 4, 1>}, {transform_indices = @transform_2, window_bounds = array<i64: 1, 4, 256>}]} {
    %c0 = arith.constant 0 : index
    %c0_0 = arith.constant 0 : index
    %c0_1 = arith.constant 0 : index
    %0 = vector.load %arg2[%c0, %c0_0, %c0_1] : memref<1x4x256xf32, #tpu.memory_space<vmem>>, vector<1x4x256xf32>
    %1 = vector.shape_cast %0 : vector<1x4x256xf32> to vector<4x256xf32>
    %c0_2 = arith.constant 0 : index
    %c0_3 = arith.constant 0 : index
    %c0_4 = arith.constant 0 : index
    %2 = vector.load %arg3[%c0_2, %c0_3, %c0_4] : memref<1x4x1xf32, #tpu.memory_space<vmem>>, vector<1x4x1xf32>
    %3 = vector.shape_cast %2 : vector<1x4x1xf32> to vector<4x1xf32>
    %4 = vector.broadcast %3 : vector<4x1xf32> to vector<4x256xf32>
    %5 = arith.mulf %1, %4 : vector<4x256xf32>
    %c0_5 = arith.constant 0 : index
    %c0_6 = arith.constant 0 : index
    %c0_7 = arith.constant 0 : index
    %6 = vector.load %arg4[%c0_5, %c0_6, %c0_7] : memref<1x4x256xf32, #tpu.memory_space<vmem>>, vector<1x4x256xf32>
    %7 = vector.shape_cast %6 : vector<1x4x256xf32> to vector<4x256xf32>
    %8 = vector.shape_cast %5 : vector<4x256xf32> to vector<1x4x256xf32>
    tpu.vector_store %arg4[%c0_5, %c0_6, %c0_7], %8 {strides = array<i32>} : memref<1x4x256xf32, #tpu.memory_space<vmem>>, vector<1x4x256xf32>,
    return
  }
  func.func @transform_0(%arg0: i32, %arg1: i32) -> (i32, i32, i32) {
    %c0_i32 = arith.constant 0 : i32
    %c0_i32_0 = arith.constant 0 : i32
    return %arg0, %c0_i32, %arg1 : i32, i32, i32
  }
  func.func @transform_1(%arg0: i32, %arg1: i32) -> (i32, i32, i32) {
    %c0_i32 = arith.constant 0 : i32
    %c0_i32_0 = arith.constant 0 : i32
    %c0_i32_1 = arith.constant 0 : i32
    return %arg0, %c0_i32, %c0_i32_0 : i32, i32, i32
  }
  func.func @transform_2(%arg0: i32, %arg1: i32) -> (i32, i32, i32) {
    %c0_i32 = arith.constant 0 : i32
    %c0_i32_0 = arith.constant 0 : i32
    return %arg0, %c0_i32, %arg1 : i32, i32, i32
  }
}

</mosaic_0001>

<bundles_post_ra>
// kernel: cam_forward.3
= control target key start
LH: loop header
LB: loop body
LE: loop exit
PB: predicated region body
PF: predicated region fallthrough
CT: control target
= control target key end

     0   :  { %s394_s9 = smov 0   ;;  %s396_s10 = smov 0   ;;  %s427_s0 = inlined_call_operand.vmem [shape: f32[2,4,256], index: 0, kind: input, shape index: {}]   ;;  %s428_s1 = inlined_call_operand.vmem [shape: f32[2,4,1], index: 1, kind: input, shape index: {}]   ;;  %s429_s2 = inlined_call_operand.vmem [shape: f32[2,4,256], index: 2, kind: output, shape index: {}]  }
   0x1   :  { %s398_s11 = smov 0  }
   0x2 LB: > { %s24_s12 = sadd.s32 1, %s371_s10  ;;  %p316_p0 = scmp.ge.s32.totalorder %s375_s11, 1  ;;  %s375_s11 = sphi %s398_s11, %s12_s11   ;;  %s371_s10 = sphi %s396_s10, %s431_s10   ;;  %s367_s9 = sphi %s394_s9, %s430_s9  }
   0x3   : > { %p26_p1 = scmp.ge.s32.totalorder %s24_s12, 2  ;;  %p142_p2 = scmp.lt.s32.totalorder %s375_s11, 3 }
   0x5   : > { %s433_s12 = smov (%p26_p1, %s24_s12), 0  ;;  %p143_p3 = pnand %p316_p0, %p142_p2 }
   0x6   : > { %p177_p4 = scmp.lt.s32.totalorder (!%p143_p3), %s367_s9, 1 }
   0x7   : > { %146 = sbr.rel (%p143_p3) target bundleno = 136 (0x88), region = 28 }
   0xc   : > { %v377_v0 = vmov 0   ;;  %s435_s9 = smov (!%p177_p4, %s367_s9), 1  ;;  %v378_v2 = vmov 839922192  }
   0xd   : > { %352 = vset.pattern.permute.xlu0 %v377_v0  ;;  %s319_s13 = sshll.u32 %s435_s9, 2  ;;  %v207_v3 = vunpack.c.l.s4 %v378_v2  ;;  %s324_s17 = sshll.u32 %s435_s9, 3 }
   0xe   : > { %s189_s16 = scalar_lea.vmem %s428_s1, %s319_s13  ;;  %s184_s20 = scalar_lea.vmem %s427_s0, %s324_s17 }
   0xf   : > { %v201_v1 = vld [vmem:[%s189_s16] sm:$0xf]  ;;  %v208_v4 = vunpack.c.0.s8 %v207_v3  ;;  %s198_s23 = scalar_lea.vmem %s429_s2, %s324_s17 }
  0x10   : > { %204 = vperm.xlu0 %352, %v201_v1   ;;  %v200_v6 = vld [vmem:[%s184_s20] sm:$0xff] }
  0x82   : > { %v205_v5 = vpop.permute.xlu0 %204 }
  0x83   : > { %v209_v7 = vperm.slane %v205_v5, %v208_v4 }
  0x85   : > { %v211_v8 = vmul.f32 %v209_v7, %v200_v6 }
  0x87   : > { %212 = vst [vmem:[%s198_s23] sm:$0xff] %v211_v8 }
  0x88 PF: > { %s12_s11 = sadd.s32 1, %s375_s11   ;;  %s430_s9 = smov %s371_s10 }
  0x89   : > { %p9_p5 = scmp.ge.s32.totalorder %s12_s11, 4   ;;  %s431_s10 = smov %s433_s12 }
  0x8b   :  { %11 = sbr.rel (!%p9_p5) target bundleno = 2 (0x2), region = 61 }

// kernel: cam_forward.2
= control target key start
LH: loop header
LB: loop body
LE: loop exit
PB: predicated region body
PF: predicated region fallthrough
CT: control target
= control target key end

     0   :  { %s304_s6 = smov 0   ;;  %s306_s7 = smov 0   ;;  %s336_s0 = inlined_call_operand.vmem [shape: f32[2,4,256], index: 0, kind: input, shape index: {}]   ;;  %s337_s1 = inlined_call_operand.vmem [shape: f32[2,4,1], index: 1, kind: output, shape index: {}]  }
   0x1   :  { %s308_s8 = smov 0  }
   0x2 LB: > { %s23_s9 = sadd.s32 1, %s287_s7  ;;  %p237_p0 = scmp.ge.s32.totalorder %s291_s8, 1  ;;  %s291_s8 = sphi %s308_s8, %s11_s8   ;;  %s287_s7 = sphi %s306_s7, %s339_s7   ;;  %s283_s6 = sphi %s304_s6, %s338_s6  }
   0x3   : > { %p25_p1 = scmp.ge.s32.totalorder %s23_s9, 2  ;;  %p106_p2 = scmp.lt.s32.totalorder %s291_s8, 3 }
   0x5   : > { %s341_s9 = smov (%p25_p1, %s23_s9), 0  ;;  %p107_p3 = pnand %p237_p0, %p106_p2 }
   0x6   : > { %p130_p4 = scmp.lt.s32.totalorder (!%p107_p3), %s283_s6, 1 }
   0x7   : > { %110 = sbr.rel (%p107_p3) target bundleno = 146 (0x92), region = 24 }
   0xc   : > { %s343_s6 = smov (!%p130_p4, %s283_s6), 1  ;;  %vm147_vm0 = vcmask 3072   ;;  %v293_v1 = vmov 0.0   ;;  %vm157_vm1 = vcmask 1043456  }
   0xd   : > { %s243_s10 = sshll.u32 %s343_s6, 3  ;;  %s240_s11 = sshll.u32 %s343_s6, 2 }
   0xe   : > { %s137_s14 = scalar_lea.vmem %s336_s0, %s243_s10  ;;  %s142_s17 = scalar_lea.vmem %s337_s1, %s240_s11 }
   0xf   : > { %v149_v0 = vld [vmem:[%s137_s14] sm:$0xff]  ;;  %148 = vst.msk [vmem:[%s142_s17] sm:$0xf] %vm147_vm0, %v293_v1 }
  0x10   : > { %152 = vst [vmem:[#allocation1] ss:$2 sm:$0xff] %v149_v0 }
  0x16   : > { %v150_v7 = vld [vmem:[%s142_s17] sm:$0xf] }
  0x17   : > { %v153_v2 = vld.sshfl [vmem:[#allocation1] sm:$0xff pattern:$0x75316420]  ;;  %v154_v3 = vld.sshfl [vmem:[#allocation1 + $0x8] sm:$0xff pattern:$0x75316420] }
  0x18   : > { %v158_v4 = vsel %vm157_vm1, %v153_v2, 0.0  ;;  %v159_v5 = vsel %vm157_vm1, %v154_v3, 0.0 }
  0x19   : > { %v160_v6 = vadd.f32 %v159_v5, %v158_v4 }
  0x1b   : > { %161 = vadd.xlane.f32.xlu0 %v160_v6 }
  0x8e   : > { %v162_v8 = vpop.xlane.xlu0 %161 }
  0x8f   : > { %v163_v9 = vadd.f32 %v162_v8, %v150_v7 }
  0x91   : > { %165 = vst.msk [vmem:[%s142_s17] sm:$0xf] %vm147_vm0, %v163_v9 }
  0x92 PF: > { %s11_s8 = sadd.s32 1, %s291_s8   ;;  %s338_s6 = smov %s287_s7 }
  0x93   : > { %p8_p5 = scmp.ge.s32.totalorder %s11_s8, 4   ;;  %s339_s7 = smov %s341_s9 }
  0x95   :  { %10 = sbr.rel (!%p8_p5) target bundleno = 2 (0x2), region = 58 }

</bundles_post_ra>
